<compile_context>
chip_gen: v7x
topology: tpu7x:2x2x1
jax: 0.10.0
libtpu: 0.0.40
codegen_flags: <defaults>
</compile_context>

<pallas_src>
import functools

import jax
import jax.numpy as jnp
from jax.experimental import pallas as pl
from jax.experimental.pallas import tpu as pltpu

BN_EPS = 1e-5


def _round_up(x, m):
    return ((x + m - 1) // m) * m


def _fused_gin_kernel(adj_ref, hin_ref, w_ref, b_ref, eps1p_ref, s2_ref, sh2_ref,
                      out_ref, h_buf, *, tm):
    l = pl.program_id(0)              # layer index (outer, sequential)
    i = pl.program_id(1)              # node row-tile index
    last_layer = pl.num_programs(0) - 1

    # Prime the "previous layer" buffer with the padded bf16 input features once.
    @pl.when(jnp.logical_and(l == 0, i == 0))
    def _():
        h_buf[1] = hin_ref[...]

    wslot = l & 1                     # slot this layer writes
    rslot = 1 - wslot                 # slot holding the previous layer's features
    row0 = pl.multiple_of(i * tm, tm)

    h_prev = h_buf[rslot]                          # (N_pad, Fp) bf16, full graph
    h_self = h_buf[rslot, pl.ds(row0, tm), :]      # (tm, Fp)    bf16, this row tile

    # GIN 'sum' aggregation: A @ h + (1 + eps) * h_self  (bf16 MXU, f32 accumulate)
    agg = jnp.dot(adj_ref[...], h_prev, preferred_element_type=jnp.float32)
    agg = agg + eps1p_ref[l] * h_self.astype(jnp.float32)

    # Linear with BN1 folded in, ReLU, BN2 folded to a post-ReLU affine, ReLU.
    z = jnp.dot(agg, w_ref[l], preferred_element_type=jnp.float32) + b_ref[l]
    z = jnp.maximum(z, 0.0)
    z = jnp.maximum(z * s2_ref[l] + sh2_ref[l], 0.0)

    # Only the last layer produces the returned features.
    @pl.when(l == last_layer)
    def _():
        out_ref[...] = z

    # Intermediate layers feed the next layer via the ping-pong scratch.
    @pl.when(l < last_layer)
    def _():
        h_buf[wslot, pl.ds(row0, tm), :] = z.astype(h_buf.dtype)


def encoder_forward(adj, features, params):
    """Encoder.forward: runs all fused GIN layers, returns final node features (N, n_hidden)."""
    N = adj.shape[0]
    in_feats = features.shape[1]
    n_layers = len(params)
    n_hidden = params[0]["w"].shape[1]

    Fp = _round_up(max(in_feats, n_hidden, 1), 128)   # lane-dense feature width
    N_pad = _round_up(max(N, 1), 128)                 # node dim padded
    tm = 256 if N_pad % 256 == 0 else 128             # node row tile
    num_tiles = N_pad // tm

    # Pad + cast. A is exactly representable in bf16 (entries are 0/1).
    adj_p = jnp.zeros((N_pad, N_pad), jnp.bfloat16).at[:N, :N].set(adj.astype(jnp.bfloat16))
    h0 = jnp.zeros((N_pad, Fp), jnp.bfloat16).at[:N, :in_feats].set(features.astype(jnp.bfloat16))

    # Fold the two eval-mode BatchNorms into the Linear + a post-ReLU affine.
    w_l, b_l, e_l, s2_l, sh2_l = [], [], [], [], []
    for lp in params:
        din = lp["w"].shape[0]
        s1 = lp["g1"] * jax.lax.rsqrt(lp["v1"] + BN_EPS)        # (1, H)
        w_f = lp["w"] * s1                                      # (din, H)  column-scaled
        b_f = (lp["b"] - lp["m1"]) * s1 + lp["be1"]             # (1, H)
        s2 = lp["g2"] * jax.lax.rsqrt(lp["v2"] + BN_EPS)        # (1, H)
        sh2 = lp["be2"] - lp["m2"] * s2                         # (1, H)
        w_l.append(jnp.zeros((Fp, Fp), jnp.float32).at[:din, :n_hidden].set(w_f))
        b_l.append(jnp.zeros((1, Fp), jnp.float32).at[:, :n_hidden].set(b_f))
        s2_l.append(jnp.zeros((1, Fp), jnp.float32).at[:, :n_hidden].set(s2))
        sh2_l.append(jnp.zeros((1, Fp), jnp.float32).at[:, :n_hidden].set(sh2))
        e_l.append(jnp.full((1, Fp), 1.0 + lp["eps"][0], jnp.float32))
    w_st = jnp.stack(w_l)      # (L, Fp, Fp)
    b_st = jnp.stack(b_l)      # (L, 1, Fp)
    e_st = jnp.stack(e_l)      # (L, 1, Fp)
    s2_st = jnp.stack(s2_l)    # (L, 1, Fp)
    sh2_st = jnp.stack(sh2_l)  # (L, 1, Fp)

    flops = n_layers * (2 * N_pad * N_pad * Fp + 2 * N_pad * Fp * Fp)
    bytes_accessed = (n_layers * N_pad * N_pad * 2     # A row tiles (bf16), worst case per layer
                      + N_pad * Fp * 2                 # input features (bf16), fetched once
                      + n_layers * Fp * Fp * 4         # folded weights
                      + N_pad * Fp * 4)                # final-layer output only

    kernel = functools.partial(_fused_gin_kernel, tm=tm)
    vec_spec = pl.BlockSpec((n_layers, 1, Fp), lambda l, i: (0, 0, 0))

    # Only the final layer's row tiles are ever written back: for l < L-1 the
    # output block index stays at (0, 0) (resident, no writeback); during the
    # last layer it follows the row tile, producing exactly one HBM write per tile.
    def out_map(l, i):
        return (jnp.where(l == n_layers - 1, i, 0), 0)

    out = pl.pallas_call(
        kernel,
        out_shape=jax.ShapeDtypeStruct((N_pad, Fp), jnp.float32),
        grid_spec=pltpu.PrefetchScalarGridSpec(
            num_scalar_prefetch=0,
            grid=(n_layers, num_tiles),
            in_specs=[
                pl.BlockSpec((tm, N_pad), lambda l, i: (i, 0)),            # A row tile
                pl.BlockSpec((N_pad, Fp), lambda l, i: (0, 0)),            # input features (resident)
                pl.BlockSpec((n_layers, Fp, Fp), lambda l, i: (0, 0, 0)),  # folded weights (resident)
                vec_spec,   # folded bias
                vec_spec,   # (1 + eps), broadcast over lanes
                vec_spec,   # BN2 scale
                vec_spec,   # BN2 shift
            ],
            out_specs=pl.BlockSpec((tm, Fp), out_map),
            scratch_shapes=[pltpu.VMEM((2, N_pad, Fp), jnp.bfloat16)],     # h ping-pong
        ),
        compiler_params=pltpu.CompilerParams(
            dimension_semantics=("arbitrary", "arbitrary"),
            vmem_limit_bytes=48 * 1024 * 1024,
        ),
        cost_estimate=pl.CostEstimate(
            flops=flops, transcendentals=0, bytes_accessed=bytes_accessed),
    )(adj_p, h0, w_st, b_st, e_st, s2_st, sh2_st)

    return out[:N, :n_hidden]


def encoder_forward_ref(adj, features, params):
    """Pure-JAX f32 reference with the original (unfolded) BN math."""
    h = features
    for lp in params:
        agg = adj @ h + (1.0 + lp["eps"][0]) * h
        z = agg @ lp["w"] + lp["b"]
        z = (z - lp["m1"]) * jax.lax.rsqrt(lp["v1"] + BN_EPS) * lp["g1"] + lp["be1"]
        z = jnp.maximum(z, 0.0)
        z = (z - lp["m2"]) * jax.lax.rsqrt(lp["v2"] + BN_EPS) * lp["g2"] + lp["be2"]
        h = jnp.maximum(z, 0.0)
    return h


def init_encoder_params(key, in_feats, n_hidden, n_layers):
    """Deterministic parameter init mirroring the PyTorch module's __init__ shapes."""
    params = []
    for layer in range(n_layers):
        din = in_feats if layer == 0 else n_hidden
        key, kw, kb = jax.random.split(key, 3)
        bound = 1.0 / jnp.sqrt(jnp.float32(din))
        # nn.Linear(din, n_hidden): weight (H, din), bias (H,). Stored transposed (din, H).
        w = jax.random.uniform(kw, (din, n_hidden), jnp.float32, -bound, bound)
        b = jax.random.uniform(kb, (1, n_hidden), jnp.float32, -bound, bound)
        params.append(dict(
            w=w, b=b,
            eps=jnp.zeros((1,), jnp.float32),                 # GINConv learn_eps init = 0
            # ApplyNodeFunc BatchNorm1d(n_hidden) defaults (eval mode)
            g1=jnp.ones((1, n_hidden), jnp.float32),
            be1=jnp.zeros((1, n_hidden), jnp.float32),
            m1=jnp.zeros((1, n_hidden), jnp.float32),
            v1=jnp.ones((1, n_hidden), jnp.float32),
            # GIN outer BatchNorm1d(n_hidden) defaults (eval mode)
            g2=jnp.ones((1, n_hidden), jnp.float32),
            be2=jnp.zeros((1, n_hidden), jnp.float32),
            m2=jnp.zeros((1, n_hidden), jnp.float32),
            v2=jnp.ones((1, n_hidden), jnp.float32),
        ))
    return params


if __name__ == "__main__":
    # Small shapes: N=16 nodes, in_feats=8, n_hidden=32, n_layers=2
    N, in_feats, n_hidden, n_layers = 16, 8, 32, 2

    key = jax.random.PRNGKey(0)
    key, k_adj, k_feat, k_params = jax.random.split(key, 4)

    # Random undirected graph as a dense adjacency (no self loops).
    a = (jax.random.uniform(k_adj, (N, N)) < 0.3).astype(jnp.float32)
    adj = jnp.clip(a + a.T, 0.0, 1.0)
    adj = adj * (1.0 - jnp.eye(N, dtype=jnp.float32))

    features = jax.random.normal(k_feat, (N, in_feats), jnp.float32)
    params = init_encoder_params(k_params, in_feats, n_hidden, n_layers)

    out = encoder_forward(adj, features, params)
    jax.block_until_ready(out)
    assert out.shape == (N, n_hidden)

    ref = encoder_forward_ref(adj, features, params)
    assert jnp.allclose(out, ref, atol=1e-1, rtol=1e-1), "mismatch vs f32 reference"

    print("KERNEL_OK")
</pallas_src>

<mosaic_0001>
module attributes {stable_mosaic.version = 11 : i64} {
  func.func @_fused_gin_kernel(%arg0: i32, %arg1: i32, %arg2: memref<128x128xbf16, #tpu.memory_space<vmem>>, %arg3: memref<128x128xbf16, #tpu.memory_space<vmem>>, %arg4: memref<2x128x128xf32, #tpu.memory_space<vmem>>, %arg5: memref<2x1x128xf32, #tpu.memory_space<vmem>>, %arg6: memref<2x1x128xf32, #tpu.memory_space<vmem>>, %arg7: memref<2x1x128xf32, #tpu.memory_space<vmem>>, %arg8: memref<2x1x128xf32, #tpu.memory_space<vmem>>, %arg9: memref<128x128xf32, #tpu.memory_space<vmem>>, %arg10: memref<2x128x128xbf16, #tpu.memory_space<vmem>>) attributes {dimension_semantics = [#tpu.dimension_semantics<arbitrary>, #tpu.dimension_semantics<arbitrary>], iteration_bounds = array<i64: 2, 1>, scalar_prefetch = 0 : i64, scratch_operands = 1 : i64, tpu.core_type = #tpu.core_type<tc>, window_params = [{transform_indices = @transform_0, window_bounds = array<i64: 128, 128>}, {pipeline_mode = #tpu.pipeline_mode<synchronous>, transform_indices = @transform_1, window_bounds = array<i64: 128, 128>}, {pipeline_mode = #tpu.pipeline_mode<synchronous>, transform_indices = @transform_2, window_bounds = array<i64: 2, 128, 128>}, {pipeline_mode = #tpu.pipeline_mode<synchronous>, transform_indices = @transform_3, window_bounds = array<i64: 2, 1, 128>}, {pipeline_mode = #tpu.pipeline_mode<synchronous>, transform_indices = @transform_4, window_bounds = array<i64: 2, 1, 128>}, {pipeline_mode = #tpu.pipeline_mode<synchronous>, transform_indices = @transform_5, window_bounds = array<i64: 2, 1, 128>}, {pipeline_mode = #tpu.pipeline_mode<synchronous>, transform_indices = @transform_6, window_bounds = array<i64: 2, 1, 128>}, {transform_indices = @transform_7, window_bounds = array<i64: 128, 128>}]} {
    %c0_i32 = arith.constant 0 : i32
    %0 = arith.cmpi eq, %arg0, %c0_i32 : i32
    %c0_i32_0 = arith.constant 0 : i32
    %1 = arith.cmpi eq, %arg1, %c0_i32_0 : i32
    %2 = arith.andi %0, %1 : i1
    %3 = arith.extui %2 : i1 to i32
    %c0_i32_1 = arith.constant 0 : i32
    %4 = arith.cmpi ne, %3, %c0_i32_1 : i32
    scf.if %4 {
      %c0_24 = arith.constant 0 : index
      %c0_25 = arith.constant 0 : index
      %54 = vector.load %arg3[%c0_24, %c0_25] : memref<128x128xbf16, #tpu.memory_space<vmem>>, vector<128x128xbf16>
      %c1 = arith.constant 1 : index
      %c0_26 = arith.constant 0 : index
      %c0_27 = arith.constant 0 : index
      %55 = vector.load %arg10[%c1, %c0_26, %c0_27] : memref<2x128x128xbf16, #tpu.memory_space<vmem>>, vector<1x128x128xbf16>
      %56 = vector.shape_cast %55 : vector<1x128x128xbf16> to vector<128x128xbf16>
      %57 = vector.shape_cast %54 : vector<128x128xbf16> to vector<1x128x128xbf16>
      tpu.vector_store %arg10[%c1, %c0_26, %c0_27], %57 {strides = array<i32>} : memref<2x128x128xbf16, #tpu.memory_space<vmem>>, vector<1x128x128xbf16>,
    } else {
    }
    %c1_i32 = arith.constant 1 : i32
    %5 = arith.andi %arg0, %c1_i32 : i32
    %c1_i32_2 = arith.constant 1 : i32
    %6 = arith.subi %c1_i32_2, %5 : i32
    %c128_i32 = arith.constant 128 : i32
    %7 = arith.muli %arg1, %c128_i32 : i32
    %8 = tpu.assume_multiple %7, 128 : i32
    %9 = arith.index_cast %6 : i32 to index
    %c0 = arith.constant 0 : index
    %c0_3 = arith.constant 0 : index
    %10 = vector.load %arg10[%9, %c0, %c0_3] : memref<2x128x128xbf16, #tpu.memory_space<vmem>>, vector<1x128x128xbf16>
    %11 = vector.shape_cast %10 : vector<1x128x128xbf16> to vector<128x128xbf16>
    %12 = arith.index_cast %6 : i32 to index
    %13 = arith.index_cast %8 : i32 to index
    %c0_4 = arith.constant 0 : index
    %14 = vector.load %arg10[%12, %13, %c0_4] : memref<2x128x128xbf16, #tpu.memory_space<vmem>>, vector<1x128x128xbf16>
    %15 = vector.shape_cast %14 : vector<1x128x128xbf16> to vector<128x128xbf16>
    %c0_5 = arith.constant 0 : index
    %c0_6 = arith.constant 0 : index
    %16 = vector.load %arg2[%c0_5, %c0_6] : memref<128x128xbf16, #tpu.memory_space<vmem>>, vector<128x128xbf16>
    %cst = arith.constant dense<0.000000e+00> : vector<128x128xf32>
    %17 = tpu.matmul %16, %11, %cst {dimension_numbers = #tpu.dot_dimension_numbers<[1], [0], [0], [1], [0, 0, 1, 1], [], []>} : vector<128x128xbf16>, vector<128x128xbf16>, vector<128x128xf32> -> vector<128x128xf32>
    %18 = arith.index_cast %arg0 : i32 to index
    %c0_7 = arith.constant 0 : index
    %c0_8 = arith.constant 0 : index
    %19 = vector.load %arg6[%18, %c0_7, %c0_8] : memref<2x1x128xf32, #tpu.memory_space<vmem>>, vector<1x1x128xf32>
    %20 = vector.shape_cast %19 : vector<1x1x128xf32> to vector<1x128xf32>
    %21 = arith.extf %15 : vector<128x128xbf16> to vector<128x128xf32>
    %22 = vector.broadcast %20 : vector<1x128xf32> to vector<128x128xf32>
    %23 = arith.mulf %22, %21 : vector<128x128xf32>
    %24 = arith.addf %17, %23 : vector<128x128xf32>
    %25 = arith.index_cast %arg0 : i32 to index
    %c0_9 = arith.constant 0 : index
    %c0_10 = arith.constant 0 : index
    %26 = vector.load %arg4[%25, %c0_9, %c0_10] : memref<2x128x128xf32, #tpu.memory_space<vmem>>, vector<1x128x128xf32>
    %27 = vector.shape_cast %26 : vector<1x128x128xf32> to vector<128x128xf32>
    %cst_11 = arith.constant dense<0.000000e+00> : vector<128x128xf32>
    %28 = tpu.matmul %24, %27, %cst_11 {dimension_numbers = #tpu.dot_dimension_numbers<[1], [0], [0], [1], [0, 0, 1, 1], [], []>} : vector<128x128xf32>, vector<128x128xf32>, vector<128x128xf32> -> vector<128x128xf32>
    %29 = arith.index_cast %arg0 : i32 to index
    %c0_12 = arith.constant 0 : index
    %c0_13 = arith.constant 0 : index
    %30 = vector.load %arg5[%29, %c0_12, %c0_13] : memref<2x1x128xf32, #tpu.memory_space<vmem>>, vector<1x1x128xf32>
    %31 = vector.shape_cast %30 : vector<1x1x128xf32> to vector<1x128xf32>
    %32 = vector.broadcast %31 : vector<1x128xf32> to vector<128x128xf32>
    %33 = arith.addf %28, %32 : vector<128x128xf32>
    %cst_14 = arith.constant 0.000000e+00 : f32
    %34 = vector.broadcast %cst_14 : f32 to vector<128x128xf32>
    %35 = arith.maximumf %33, %34 : vector<128x128xf32>
    %36 = arith.index_cast %arg0 : i32 to index
    %c0_15 = arith.constant 0 : index
    %c0_16 = arith.constant 0 : index
    %37 = vector.load %arg7[%36, %c0_15, %c0_16] : memref<2x1x128xf32, #tpu.memory_space<vmem>>, vector<1x1x128xf32>
    %38 = vector.shape_cast %37 : vector<1x1x128xf32> to vector<1x128xf32>
    %39 = vector.broadcast %38 : vector<1x128xf32> to vector<128x128xf32>
    %40 = arith.mulf %35, %39 : vector<128x128xf32>
    %41 = arith.index_cast %arg0 : i32 to index
    %c0_17 = arith.constant 0 : index
    %c0_18 = arith.constant 0 : index
    %42 = vector.load %arg8[%41, %c0_17, %c0_18] : memref<2x1x128xf32, #tpu.memory_space<vmem>>, vector<1x1x128xf32>
    %43 = vector.shape_cast %42 : vector<1x1x128xf32> to vector<1x128xf32>
    %44 = vector.broadcast %43 : vector<1x128xf32> to vector<128x128xf32>
    %45 = arith.addf %40, %44 : vector<128x128xf32>
    %cst_19 = arith.constant 0.000000e+00 : f32
    %46 = vector.broadcast %cst_19 : f32 to vector<128x128xf32>
    %47 = arith.maximumf %45, %46 : vector<128x128xf32>
    %c1_i32_20 = arith.constant 1 : i32
    %48 = arith.cmpi eq, %arg0, %c1_i32_20 : i32
    %49 = arith.extui %48 : i1 to i32
    %c0_i32_21 = arith.constant 0 : i32
    %50 = arith.cmpi ne, %49, %c0_i32_21 : i32
    scf.if %50 {
      %c0_24 = arith.constant 0 : index
      %c0_25 = arith.constant 0 : index
      %54 = vector.load %arg9[%c0_24, %c0_25] : memref<128x128xf32, #tpu.memory_space<vmem>>, vector<128x128xf32>
      tpu.vector_store %arg9[%c0_24, %c0_25], %47 {strides = array<i32>} : memref<128x128xf32, #tpu.memory_space<vmem>>, vector<128x128xf32>,
    } else {
    }
    %c1_i32_22 = arith.constant 1 : i32
    %51 = arith.cmpi slt, %arg0, %c1_i32_22 : i32
    %52 = arith.extui %51 : i1 to i32
    %c0_i32_23 = arith.constant 0 : i32
    %53 = arith.cmpi ne, %52, %c0_i32_23 : i32
    scf.if %53 {
      %54 = arith.truncf %47 : vector<128x128xf32> to vector<128x128xbf16>
      %55 = arith.index_cast %5 : i32 to index
      %56 = arith.index_cast %8 : i32 to index
      %c0_24 = arith.constant 0 : index
      %57 = vector.load %arg10[%55, %56, %c0_24] : memref<2x128x128xbf16, #tpu.memory_space<vmem>>, vector<1x128x128xbf16>
      %58 = vector.shape_cast %57 : vector<1x128x128xbf16> to vector<128x128xbf16>
      %59 = vector.shape_cast %54 : vector<128x128xbf16> to vector<1x128x128xbf16>
      tpu.vector_store %arg10[%55, %56, %c0_24], %59 {strides = array<i32>} : memref<2x128x128xbf16, #tpu.memory_space<vmem>>, vector<1x128x128xbf16>,
    } else {
    }
    return
  }
  func.func @transform_0(%arg0: i32, %arg1: i32) -> (i32, i32) {
    %c0_i32 = arith.constant 0 : i32
    %c0_i32_0 = arith.constant 0 : i32
    return %arg1, %c0_i32 : i32, i32
  }
  func.func @transform_1(%arg0: i32, %arg1: i32) -> (i32, i32) {
    %c0_i32 = arith.constant 0 : i32
    %c0_i32_0 = arith.constant 0 : i32
    %c0_i32_1 = arith.constant 0 : i32
    return %c0_i32, %c0_i32_0 : i32, i32
  }
  func.func @transform_2(%arg0: i32, %arg1: i32) -> (i32, i32, i32) {
    %c0_i32 = arith.constant 0 : i32
    %c0_i32_0 = arith.constant 0 : i32
    %c0_i32_1 = arith.constant 0 : i32
    %c0_i32_2 = arith.constant 0 : i32
    return %c0_i32, %c0_i32_0, %c0_i32_1 : i32, i32, i32
  }
  func.func @transform_3(%arg0: i32, %arg1: i32) -> (i32, i32, i32) {
    %c0_i32 = arith.constant 0 : i32
    %c0_i32_0 = arith.constant 0 : i32
    %c0_i32_1 = arith.constant 0 : i32
    %c0_i32_2 = arith.constant 0 : i32
    return %c0_i32, %c0_i32_0, %c0_i32_1 : i32, i32, i32
  }
  func.func @transform_4(%arg0: i32, %arg1: i32) -> (i32, i32, i32) {
    %c0_i32 = arith.constant 0 : i32
    %c0_i32_0 = arith.constant 0 : i32
    %c0_i32_1 = arith.constant 0 : i32
    %c0_i32_2 = arith.constant 0 : i32
    return %c0_i32, %c0_i32_0, %c0_i32_1 : i32, i32, i32
  }
  func.func @transform_5(%arg0: i32, %arg1: i32) -> (i32, i32, i32) {
    %c0_i32 = arith.constant 0 : i32
    %c0_i32_0 = arith.constant 0 : i32
    %c0_i32_1 = arith.constant 0 : i32
    %c0_i32_2 = arith.constant 0 : i32
    return %c0_i32, %c0_i32_0, %c0_i32_1 : i32, i32, i32
  }
  func.func @transform_6(%arg0: i32, %arg1: i32) -> (i32, i32, i32) {
    %c0_i32 = arith.constant 0 : i32
    %c0_i32_0 = arith.constant 0 : i32
    %c0_i32_1 = arith.constant 0 : i32
    %c0_i32_2 = arith.constant 0 : i32
    return %c0_i32, %c0_i32_0, %c0_i32_1 : i32, i32, i32
  }
  func.func @transform_7(%arg0: i32, %arg1: i32) -> (i32, i32) {
    %c1_i32 = arith.constant 1 : i32
    %0 = arith.cmpi eq, %arg0, %c1_i32 : i32
    %c0_i32 = arith.constant 0 : i32
    %1 = arith.select %0, %arg1, %c0_i32 : i32
    %c0_i32_0 = arith.constant 0 : i32
    %c0_i32_1 = arith.constant 0 : i32
    return %1, %c0_i32_0 : i32, i32
  }
}

</mosaic_0001>

<bundles_post_ra>
// kernel: tpu_custom_call.1
= control target key start
LH: loop header
LB: loop body
LE: loop exit
PB: predicated region body
PF: predicated region fallthrough
CT: control target
= control target key end

     0   :  { %12 = vsyncpa [#allocation4], 0  ;;  %s1939_s0 = inlined_call_operand.hbm [shape: bf16[128,128], index: 0, kind: input, shape index: {}]   ;;  %s1940_s1 = inlined_call_operand.hbm [shape: bf16[128,128], index: 1, kind: input, shape index: {}]   ;;  %s1941_s2 = inlined_call_operand.hbm [shape: f32[2,128,128], index: 2, kind: input, shape index: {}]   ;;  %s1942_s3 = inlined_call_operand.vmem [shape: f32[2,1,128], index: 3, kind: input, shape index: {}]   ;;  %s1943_s4 = inlined_call_operand.vmem [shape: f32[2,1,128], index: 4, kind: input, shape index: {}]   ;;  %s1944_s5 = inlined_call_operand.vmem [shape: f32[2,1,128], index: 5, kind: input, shape index: {}]   ;;  %s1945_s6 = inlined_call_operand.vmem [shape: f32[2,1,128], index: 6, kind: input, shape index: {}]   ;;  %s1946_s7 = inlined_call_operand.hbm [shape: f32[128,128], index: 7, kind: output, shape index: {}]  }
   0x1   :  { %13 = vsyncpa [#allocation7], 0 }
   0x2   :  { %14 = vsyncpa [#allocation5], 0 }
   0x3   :  { %16 = vsyncpa [#allocation5 + $0x1], 0  ;;  %s1555_s24 = smov 0   ;;  %s1557_s25 = smov 0  }
   0x4   :  { %s1559_s26 = smov 0  }
   0x5 LB: > { %s1950_s27 = sadd.s32 4294967295, %s1503_s26   ;;  %p1057_p0 = scmp.ge.s32.totalorder %s1503_s26, 1  ;;  %s1503_s26 = sphi %s1559_s26, %s22_s26   ;;  %s1499_s25 = sphi %s1557_s25, %s1963_s25   ;;  %s1495_s24 = sphi %s1555_s24, %s1962_s24  }
   0x6   : > { %p221_p1 = scmp.lt.s32.totalorder %s1503_s26, 3  ;;  %p1576_p2 = scmp.eq.s32.totalorder %s1950_s27, 0 }
   0x7   : > { %s1505_s8 = smov [#allocation6]   ;;  %s34_s11 = sadd.s32 1, %s1499_s25 }
   0x8   : > { %s1951_s29 = scalar_select %p1576_p2, 1, 0 }
   0x9   : > { %p1580_p3 = pnand %p1057_p0, %p221_p1  ;;  %s249_s9 = sshll.u32 %s1505_s8, 4  ;;  %s250_s9 = int_to_ptr.vmem [resolvable:$true] %s249_s9 }
   0xa   : > { %p1593_p6 = scmp.ge.s32.totalorder %s34_s11, 2  ;;  %s1359_s15 = scalar_lea.hbm %s1940_s1, 1024 }
   0xb   : > { %s1952_s30 = scalar_select %p1580_p3, 1, 0 }
   0xc   : > { %p1286_p4 = pneg %p1580_p3  ;;  %p1360_p7 = scmp.ne.s32.totalorder %s1940_s1, %s1359_s15 }
   0xd   : > { %s1954_s12 = scalar_select %p1593_p6, 1, 0 }
   0xe   : > { %p1588_p5 = pnand %p1576_p2, %p1286_p4  ;;  %p1366_p11 = scmp.lt.u32.totalorder %s1359_s15, %s1940_s1 }
  0x10   : > { %p1605_p8 = pneg %p1588_p5 }
  0x12   : > { %p1362_p9 = pnand %p1605_p8, %p1360_p7 }
  0x14   : > { %p1363_p10 = pneg %p1362_p9 }
  0x16   : > { %p1368_p12 = pnand %p1366_p11, %p1363_p10 }
  0x18   : > { %1371 = shalt.err (!%p1368_p12)
}
  0x19   : > { %s1372_s21 = scalar_lea.vmem %s250_s9, 1024  ;;  %p1380_p4 = scmp.lt.s32.totalorder %s250_s9, %s250_s9 }
  0x1a   : > { %p1373_p13 = scmp.ne.s32.totalorder %s250_s9, %s1372_s21  ;;  %p1381_p2 = scmp.lt.s32.totalorder %s1372_s21, %s1372_s21 }
  0x1c   : > { %p1375_p0 = pnand %p1373_p13, %p1605_p8  ;;  %p1382_p3 = por %p1381_p2, %p1380_p4 }
  0x1e   : > { %p1376_p1 = pneg %p1375_p0 }
  0x20   : > { %p1383_p6 = pnand %p1382_p3, %p1376_p1 }
  0x22   : > { %1386 = shalt.err (!%p1383_p6)
}
  0x23   : > { %s1506_s22 = smov 64   ;;  %s1507_s23 = smov 4  }
  0x24   : > { %1292 = dma.hbm_to_vmem [thread:$0]  (!%p1588_p5), %s1940_s1, 1024, %s250_s9, [#allocation7], %s1506_s22, %s1506_s22, %s1507_s23  }
  0x25   : > { %p1956_p7 = scmp.ne.s32.totalorder %s1954_s12, 0  ;;  %s1508_s14 = smov [#allocation3]  }
  0x26   : > { %s236_s15 = sshll.u32 %s1508_s14, 4  ;;  %s1509_s16 = smov [#allocation8]   ;;  %s237_s15 = int_to_ptr.vmem [resolvable:$true] %s236_s15 }
  0x27   : > { %s1965_s11 = smov (%p1956_p7, %s34_s11), 0  ;;  %s262_s17 = sshll.u32 %s1509_s16, 4  ;;  %s263_s17 = int_to_ptr.vmem [resolvable:$true] %s262_s17 }
  0x28   : > { %s1387_s21 = scalar_lea.hbm %s1939_s0, 1024 }
  0x29   : > { %p1388_p2 = scmp.ne.s32.totalorder %s1939_s0, %s1387_s21  ;;  %p1394_p9 = scmp.lt.u32.totalorder %s1387_s21, %s1939_s0 }
  0x2b   : > { %p1390_p3 = pnand %p1388_p2, %p1605_p8 }
  0x2d   : > { %p1391_p6 = pneg %p1390_p3 }
  0x2f   : > { %p1396_p10 = pnand %p1394_p9, %p1391_p6 }
  0x31   : > { %1399 = shalt.err (!%p1396_p10)
}
  0x32   : > { %s1400_s8 = scalar_lea.vmem %s237_s15, 1024  ;;  %p1408_p0 = scmp.lt.s32.totalorder %s237_s15, %s237_s15 }
  0x33   : > { %p1401_p11 = scmp.ne.s32.totalorder %s237_s15, %s1400_s8  ;;  %p1409_p1 = scmp.lt.s32.totalorder %s1400_s8, %s1400_s8 }
  0x35   : > { %p1403_p12 = pnand %p1401_p11, %p1605_p8  ;;  %p1410_p4 = por %p1409_p1, %p1408_p0 }
  0x37   : > { %p1404_p13 = pneg %p1403_p12 }
  0x39   : > { %p1411_p7 = pnand %p1410_p4, %p1404_p13 }
  0x3b   : > { %1414 = shalt.err (!%p1411_p7)
}
  0x3c   : > { %1289 = dma.hbm_to_vmem [thread:$0]  (!%p1588_p5), %s1939_s0, 1024, %s237_s15, [#allocation4], %s1506_s22, %s1506_s22, %s1507_s23  }
  0x3d   : > { %s1415_s16 = scalar_lea.hbm %s1941_s2, 4096 }
  0x3e   : > { %p1416_p2 = scmp.ne.s32.totalorder %s1941_s2, %s1415_s16  ;;  %p1422_p9 = scmp.lt.u32.totalorder %s1415_s16, %s1941_s2 }
  0x40   : > { %p1418_p3 = pnand %p1416_p2, %p1605_p8 }
  0x42   : > { %p1419_p6 = pneg %p1418_p3 }
  0x44   : > { %p1424_p10 = pnand %p1422_p9, %p1419_p6 }
  0x46   : > { %1427 = shalt.err (!%p1424_p10)
}
  0x47   : > { %s1428_s12 = scalar_lea.vmem %s263_s17, 4096  ;;  %p1436_p0 = scmp.lt.s32.totalorder %s263_s17, %s263_s17 }
  0x48   : > { %p1429_p11 = scmp.ne.s32.totalorder %s263_s17, %s1428_s12  ;;  %p1437_p1 = scmp.lt.s32.totalorder %s1428_s12, %s1428_s12 }
  0x4a   : > { %p1431_p12 = pnand %p1429_p11, %p1605_p8  ;;  %p1438_p4 = por %p1437_p1, %p1436_p0 }
  0x4c   : > { %p1432_p13 = pneg %p1431_p12 }
  0x4e   : > { %p1439_p7 = pnand %p1438_p4, %p1432_p13 }
  0x50   : > { %1442 = shalt.err (!%p1439_p7)
}
  0x51   : > { %s1510_s22 = smov 128   ;;  %s1511_s23 = smov 8  }
  0x52   : > { %1295 = dma.hbm_to_vmem [thread:$0]  (!%p1588_p5), %s1941_s2, 4096, %s263_s17, [#allocation7], %s1510_s22, %s1510_s22, %s1511_s23  }
  0x53   : > { %p1957_p2 = scmp.ne.s32.totalorder %s1952_s30, 0 }
  0x54   : > { %p1958_p3 = scmp.ne.s32.totalorder (!%p1957_p2), %s1951_s29, 0 }
  0x55   : > { %290 = sbr.rel (%p1957_p2) target bundleno = 643 (0x283), region = 48 }
  0x5c   : > { %1482 = dma.done.wait (%p1958_p3), [#allocation4], 1024  }
  0x5d   : > { %1484 = vsyncadd (%p1958_p3), [#allocation4], 4294966272 }
  0x5e   : > { %1486 = dma.done.wait (%p1958_p3), [#allocation7], 5120  }
  0x5f   : > { %1488 = vsyncadd (%p1958_p3), [#allocation7], 4294962176  ;;  %p330_p8 = scmp.eq.s32.totalorder %s1495_s24, 0 }
  0x60   : > { %v1343_v0 = vld [vmem:[#allocation6] sm:$0xff] (%p330_p8)   ;;  %v1344_v1 = vld [vmem:[#allocation6 + $0x8] sm:$0xff] (%p330_p8)   ;;  %v1345_v2 = vld [vmem:[#allocation6 + $0x10] sm:$0xff] (%p330_p8)  }
  0x61   : > { %335 = sbr.rel (!%p330_p8) target bundleno = 104 (0x68), region = 64  ;;  %401 = vst [vmem:[#allocation2 + $0x40] sm:$0xff] (%p330_p8), %v1343_v0  ;;  %402 = vst [vmem:[#allocation2 + $0x48] sm:$0xff] (%p330_p8), %v1344_v1  ;;  %v1346_v3 = vld [vmem:[#allocation6 + $0x18] sm:$0xff] (%p330_p8)   ;;  %v1347_v4 = vld [vmem:[#allocation6 + $0x20] sm:$0xff] (%p330_p8)  }
  0x62   : > { %403 = vst [vmem:[#allocation2 + $0x50] sm:$0xff] (%p330_p8), %v1345_v2  ;;  %404 = vst [vmem:[#allocation2 + $0x58] sm:$0xff] (%p330_p8), %v1346_v3  ;;  %v1348_v5 = vld [vmem:[#allocation6 + $0x28] sm:$0xff] (%p330_p8)   ;;  %v1349_v6 = vld [vmem:[#allocation6 + $0x30] sm:$0xff] (%p330_p8)  }
  0x63   : > { %405 = vst [vmem:[#allocation2 + $0x60] sm:$0xff] (%p330_p8), %v1347_v4  ;;  %406 = vst [vmem:[#allocation2 + $0x68] sm:$0xff] (%p330_p8), %v1348_v5  ;;  %v1350_v7 = vld [vmem:[#allocation6 + $0x38] sm:$0xff] (%p330_p8)  }
  0x64   : > { %407 = vst [vmem:[#allocation2 + $0x70] sm:$0xff] (%p330_p8), %v1349_v6  ;;  %408 = vst [vmem:[#allocation2 + $0x78] sm:$0xff] (%p330_p8), %v1350_v7 }
  0x68 PF: > { %s409_s29 = sand.u32 1, %s1495_s24  ;;  %v1351_v8 = vld [vmem:[#allocation3] sm:$0xff]   ;;  %s1086_s17 = sshll.u32 %s1495_s24, 7  ;;  %v1352_v38 = vld [vmem:[#allocation3 + $0x8] sm:$0xff]   ;;  %v1353_v39 = vld [vmem:[#allocation3 + $0x10] sm:$0xff]  }
  0x69   : > { %s410_s30 = ssub.s32 1, %s409_s29  ;;  %1166 = vmatprep.mubr.bf16.mxu0 %v1351_v8  ;;  %s1691_s27 = scalar_lea.vmem [#allocation8], %s1086_s17  ;;  %v1354_v40 = vld [vmem:[#allocation3 + $0x18] sm:$0xff]   ;;  %v1355_v41 = vld [vmem:[#allocation3 + $0x20] sm:$0xff]   ;;  %v1356_v42 = vld [vmem:[#allocation3 + $0x28] sm:$0xff]  }
  0x6a   : > { %s1099_s10 = sshll.u32 %s410_s30, 6  ;;  %v639_v12 = vld [vmem:[%s1691_s27] sm:$0xff]  ;;  %v640_v13 = vld [vmem:[%s1691_s27 + $0x8] sm:$0xff]  ;;  %v641_v14 = vld [vmem:[%s1691_s27 + $0x10] sm:$0xff]  ;;  %s452_s14 = scalar_lea.vmem %s1943_s4, %s1495_s24 }
  0x6b   : > { %s1675_s18 = scalar_lea.vmem [#allocation2], %s1099_s10  ;;  %v642_v15 = vld [vmem:[%s1691_s27 + $0x18] sm:$0xff]  ;;  %v1238_v17 = vpack.c.bf16 %v640_v13, %v639_v12  ;;  %v643_v19 = vld [vmem:[%s1691_s27 + $0x20] sm:$0xff]  ;;  %v644_v20 = vld [vmem:[%s1691_s27 + $0x28] sm:$0xff]  ;;  %s655_s20 = scalar_lea.vmem %s1942_s3, %s1495_s24 }
  0x6c   : > { %v1678_v9 = vld [vmem:[%s1675_s18] sm:$0xff]  ;;  %v1681_v10 = vld [vmem:[%s1675_s18 + $0x8] sm:$0xff]  ;;  %v1688_v11 = vld [vmem:[%s1675_s18 + $0x10] sm:$0xff]  ;;  %v1242_v18 = vpack.c.bf16 %v642_v15, %v641_v14  ;;  %v1246_v22 = vpack.c.bf16 %v644_v20, %v643_v19  ;;  %s824_s12 = scalar_lea.vmem %s1944_s5, %s1495_s24  ;;  %s848_s15 = scalar_lea.vmem %s1945_s6, %s1495_s24 }
  0x6d   : > { %1150 = vmatprep.subr.bf16.mxu0 %v1678_v9  ;;  %v1699_v16 = vld [vmem:[%s1675_s18 + $0x18] sm:$0xff]  ;;  %1239 = vmatprep.subr.bf16.mxu1 %v1238_v17  ;;  %v1706_v21 = vld [vmem:[%s1675_s18 + $0x20] sm:$0xff]  ;;  %v645_v23 = vld [vmem:[%s1691_s27 + $0x30] sm:$0xff]  ;;  %v454_v48 = vunpack.c.l.bf16 %v1678_v9  ;;  %v455_v50 = vunpack.c.h.bf16 %v1678_v9  ;;  %v456_v51 = vunpack.c.l.bf16 %v1681_v10  ;;  %v457_v54 = vunpack.c.h.bf16 %v1681_v10  ;;  %p1090_p5 = scmp.ne.s32.totalorder %s1495_s24, 1 }
  0x6e   : > { %1151 = vmatpush3.bf16.msra.mxu0 %v1678_v9  ;;  %1241 = vmatpush3.bf16.msra.mxu1 %v1238_v17  ;;  %v646_v24 = vld [vmem:[%s1691_s27 + $0x38] sm:$0xff]  ;;  %v1713_v25 = vld [vmem:[%s1675_s18 + $0x28] sm:$0xff]  ;;  %v647_v27 = vld [vmem:[%s1691_s27 + $0x40] sm:$0xff]  ;;  %v458_v60 = vunpack.c.l.bf16 %v1688_v11  ;;  %v459_v0 = vunpack.c.h.bf16 %v1688_v11  ;;  %v460_v2 = vunpack.c.l.bf16 %v1699_v16  ;;  %v461_v6 = vunpack.c.h.bf16 %v1699_v16 }
  0x6f   : > { %1152 = vmatprep.subr.bf16.mxu0 %v1681_v10  ;;  %1243 = vmatprep.subr.bf16.mxu1 %v1242_v18  ;;  %v1250_v26 = vpack.c.bf16 %v646_v24, %v645_v23  ;;  %v648_v28 = vld [vmem:[%s1691_s27 + $0x48] sm:$0xff]  ;;  %v1720_v29 = vld [vmem:[%s1675_s18 + $0x30] sm:$0xff]  ;;  %v650_v32 = vld [vmem:[%s1691_s27 + $0x58] sm:$0xff]  ;;  %v463_v17 = vunpack.c.h.bf16 %v1706_v21  ;;  %v465_v23 = vunpack.c.h.bf16 %v1713_v25 }
  0x70   : > { %v1254_v30 = vpack.c.bf16 %v648_v28, %v647_v27  ;;  %v649_v31 = vld [vmem:[%s1691_s27 + $0x50] sm:$0xff]  ;;  %v1727_v33 = vld [vmem:[%s1675_s18 + $0x38] sm:$0xff]  ;;  %v651_v35 = vld [vmem:[%s1691_s27 + $0x60] sm:$0xff] }
  0x71   : > { %v1258_v34 = vpack.c.bf16 %v650_v32, %v649_v31  ;;  %v652_v36 = vld [vmem:[%s1691_s27 + $0x68] sm:$0xff]  ;;  %v1357_v43 = vld [vmem:[#allocation3 + $0x30] sm:$0xff]   ;;  %v1358_v44 = vld [vmem:[#allocation3 + $0x38] sm:$0xff]  }
  0x72   : > { %1153 = vmatpush3.bf16.msra.mxu0 %v1681_v10  ;;  %1245 = vmatpush3.bf16.msra.mxu1 %v1242_v18  ;;  %v1262_v37 = vpack.c.bf16 %v652_v36, %v651_v35  ;;  %v653_v45 = vld [vmem:[%s1691_s27 + $0x70] sm:$0xff]  ;;  %v654_v46 = vld [vmem:[%s1691_s27 + $0x78] sm:$0xff]  ;;  %v1741_v49 = vld [vmem:[%s452_s14] ss:$0 sm:$0xff]  ;;  %v467_v35 = vunpack.c.h.bf16 %v1720_v29 }
  0x73   : > { %1154 = vmatprep.subr.bf16.mxu0 %v1688_v11  ;;  %1247 = vmatprep.subr.bf16.mxu1 %v1246_v22  ;;  %v1266_v47 = vpack.c.bf16 %v654_v46, %v653_v45  ;;  %v476_v52 = vmul.f32 %v1741_v49, %v454_v48  ;;  %v477_v55 = vmul.f32 %v1741_v49, %v455_v50  ;;  %v1778_v50 = vld [vmem:[%s655_s20] ss:$0 sm:$0xff] }
  0x74   : > { %v478_v56 = vmul.f32 %v1741_v49, %v456_v51  ;;  %v479_v62 = vmul.f32 %v1741_v49, %v457_v54  ;;  %v480_v3 = vmul.f32 %v1741_v49, %v458_v60  ;;  %v481_v7 = vmul.f32 %v1741_v49, %v459_v0 }
  0x75   : > { %v482_v8 = vmul.f32 %v1741_v49, %v460_v2  ;;  %v483_v14 = vmul.f32 %v1741_v49, %v461_v6  ;;  %v485_v24 = vmul.f32 %v1741_v49, %v463_v17  ;;  %v487_v32 = vmul.f32 %v1741_v49, %v465_v23 }
  0x76   : > { %1155 = vmatpush3.bf16.msra.mxu0 %v1688_v11  ;;  %1249 = vmatpush3.bf16.msra.mxu1 %v1246_v22  ;;  %v462_v11 = vunpack.c.l.bf16 %v1706_v21 }
  0x77   : > { %1156 = vmatprep.subr.bf16.mxu0 %v1699_v16  ;;  %1251 = vmatprep.subr.bf16.mxu1 %v1250_v26 }
  0x78   : > { %v484_v19 = vmul.f32 %v1741_v49, %v462_v11 }
  0x7a   : > { %1157 = vmatpush3.bf16.msra.mxu0 %v1699_v16  ;;  %1253 = vmatpush3.bf16.msra.mxu1 %v1250_v26  ;;  %v464_v16 = vunpack.c.l.bf16 %v1713_v25 }
  0x7b   : > { %1158 = vmatprep.subr.bf16.mxu0 %v1706_v21  ;;  %1255 = vmatprep.subr.bf16.mxu1 %v1254_v30 }
  0x7c   : > { %v486_v26 = vmul.f32 %v1741_v49, %v464_v16 }
  0x7e   : > { %1159 = vmatpush3.bf16.msra.mxu0 %v1706_v21  ;;  %1257 = vmatpush3.bf16.msra.mxu1 %v1254_v30  ;;  %v466_v21 = vunpack.c.l.bf16 %v1720_v29 }
  0x7f   : > { %1160 = vmatprep.subr.bf16.mxu0 %v1713_v25  ;;  %1259 = vmatprep.subr.bf16.mxu1 %v1258_v34 }
  0x82   : > { %1161 = vmatpush3.bf16.msra.mxu0 %v1713_v25  ;;  %1261 = vmatpush3.bf16.msra.mxu1 %v1258_v34  ;;  %v468_v25 = vunpack.c.l.bf16 %v1727_v33 }
  0x83   : > { %1162 = vmatprep.subr.bf16.mxu0 %v1720_v29  ;;  %1263 = vmatprep.subr.bf16.mxu1 %v1262_v37 }
  0x86   : > { %1163 = vmatpush3.bf16.msra.mxu0 %v1720_v29  ;;  %1265 = vmatpush3.bf16.msra.mxu1 %v1262_v37  ;;  %v488_v37 = vmul.f32 %v1741_v49, %v466_v21 }
  0x87   : > { %1164 = vmatprep.subr.bf16.mxu0 %v1727_v33  ;;  %1267 = vmatprep.subr.bf16.mxu1 %v1266_v47 }
  0x8a   : > { %1165 = vmatpush3.bf16.msra.mxu0 %v1727_v33  ;;  %1269 = vmatpush3.bf16.msra.mxu1 %v1266_v47 }
  0x8d   : > { %1167 = vmatmul.mubr.bf16.vlgmr.msra.gmra.mrb[0].mxu0 %v1352_v38 }
  0x8e   : > { %1170 = vmatprep.mubr.bf16.mxu0 %v1353_v39 }
  0x95   : > { %1171 = vmatmul.mubr.bf16.gmra.mrb[4].mxu0 %v1354_v40  ;;  %v469_v40 = vunpack.c.h.bf16 %v1727_v33 }
  0x96   : > { %1174 = vmatprep.mubr.bf16.mxu0 %v1355_v41  ;;  %v489_v41 = vmul.f32 %v1741_v49, %v467_v35 }
  0x97   : > { %v491_v46 = vmul.f32 %v1741_v49, %v469_v40 }
  0x9d   : > { %1175 = vmatmul.mubr.bf16.gmra.mrb[8].mxu0 %v1356_v42  ;;  %v490_v42 = vmul.f32 %v1741_v49, %v468_v25 }
  0x9e   : > { %1178 = vmatprep.mubr.bf16.mxu0 %v1357_v43 }
  0xa5   : > { %1179 = vmatmul.mubr.bf16.gmra.mrb[12].mxu0 %v1358_v44 }
 0x160   : > { %v1168_v53 = vpop.f32.mrb[0].mxu0 }
 0x161   : > { %v574_v57 = vpop.f32.mrb[1].mxu0  ;;  %v583_v1 = vadd.f32 %v1168_v53, %v478_v56  ;;  %v1789_v53 = vld [vmem:[%s824_s12] ss:$0 sm:$0xff] }
 0x162   : > { %v1169_v58 = vpop.f32.mrb[2].mxu0  ;;  %v575_v59 = vadd.f32 %v574_v57, %v476_v52  ;;  %v1792_v56 = vld [vmem:[%s848_s15] ss:$0 sm:$0xff] }
 0x163   : > { %v577_v61 = vpop.f32.mrb[3].mxu0  ;;  %v586_v4 = vadd.f32 %v1169_v58, %v479_v62 }
 0x164   : > { %v578_v63 = vadd.f32 %v577_v61, %v477_v55  ;;  %1214 = vmatprep.mubr.f32.mxu1 %v575_v59 }
 0x166   : > { %1215 = vmatmul.mubr.f32.vlgmr.msra.gmra.mrb[0].mxu1 %v578_v63 }
 0x167   : > { %1217 = vmatprep.mubr.f32.mxu1 %v583_v1 }
 0x168   : > { %v1172_v5 = vpop.f32.mrb[4].mxu0 }
 0x169   : > { %v590_v9 = vpop.f32.mrb[5].mxu0  ;;  %v599_v18 = vadd.f32 %v1172_v5, %v482_v8 }
 0x16a   : > { %v591_v10 = vadd.f32 %v590_v9, %v480_v3  ;;  %v1173_v12 = vpop.f32.mrb[6].mxu0  ;;  %1218 = vmatmul.mubr.f32.gmra.mrb[2].mxu1 %v586_v4 }
 0x16b   : > { %v593_v13 = vpop.f32.mrb[7].mxu0  ;;  %v602_v20 = vadd.f32 %v1173_v12, %v483_v14 }
 0x16c   : > { %v594_v15 = vadd.f32 %v593_v13, %v481_v7  ;;  %1220 = vmatprep.mubr.f32.mxu1 %v591_v10 }
 0x16e   : > { %1221 = vmatmul.mubr.f32.gmra.mrb[4].mxu1 %v594_v15 }
 0x16f   : > { %1223 = vmatprep.mubr.f32.mxu1 %v599_v18 }
 0x170   : > { %v1176_v22 = vpop.f32.mrb[8].mxu0 }
 0x171   : > { %v606_v27 = vpop.f32.mrb[9].mxu0  ;;  %v615_v36 = vadd.f32 %v1176_v22, %v486_v26 }
 0x172   : > { %v607_v28 = vadd.f32 %v606_v27, %v484_v19  ;;  %v1177_v30 = vpop.f32.mrb[10].mxu0  ;;  %1224 = vmatmul.mubr.f32.gmra.mrb[6].mxu1 %v602_v20 }
 0x173   : > { %v609_v31 = vpop.f32.mrb[11].mxu0  ;;  %v618_v38 = vadd.f32 %v1177_v30, %v487_v32 }
 0x174   : > { %v610_v34 = vadd.f32 %v609_v31, %v485_v24  ;;  %1226 = vmatprep.mubr.f32.mxu1 %v607_v28 }
 0x176   : > { %1227 = vmatmul.mubr.f32.gmra.mrb[8].mxu1 %v610_v34 }
 0x177   : > { %1229 = vmatprep.mubr.f32.mxu1 %v615_v36 }
 0x178   : > { %v1180_v39 = vpop.f32.mrb[12].mxu0 }
 0x179   : > { %v622_v43 = vpop.f32.mrb[13].mxu0  ;;  %v631_v48 = vadd.f32 %v1180_v39, %v490_v42 }
 0x17a   : > { %v623_v44 = vadd.f32 %v622_v43, %v488_v37  ;;  %v1181_v29 = vpop.f32.mrb[14].mxu0  ;;  %1230 = vmatmul.mubr.f32.gmra.mrb[10].mxu1 %v618_v38 }
 0x17b   : > { %v625_v45 = vpop.f32.mrb[15].mxu0  ;;  %v634_v33 = vadd.f32 %v1181_v29, %v491_v46 }
 0x17c   : > { %v626_v47 = vadd.f32 %v625_v45, %v489_v41  ;;  %1232 = vmatprep.mubr.f32.mxu1 %v623_v44 }
 0x17e   : > { %1233 = vmatmul.mubr.f32.gmra.mrb[12].mxu1 %v626_v47 }
 0x17f   : > { %1235 = vmatprep.mubr.f32.mxu1 %v631_v48 }
 0x182   : > { %1236 = vmatmul.mubr.f32.gmra.mrb[14].mxu1 %v634_v33 }
 0x239   : > { %v1216_v51 = vpop.f32.mrb[0].mxu1 }
 0x23a   : > { %v735_v49 = vadd.f32 %v1216_v51, %v1778_v50  ;;  %v729_v52 = vpop.f32.mrb[1].mxu1 }
 0x23b   : > { %v730_v54 = vadd.f32 %v1778_v50, %v729_v52 }
 0x23c   : > { %v809_v55 = vmax.f32 %v735_v49, 0.0 }
 0x23d   : > { %v808_v57 = vmax.f32 %v730_v54, 0.0  ;;  %v1219_v58 = vpop.f32.mrb[2].mxu1 }
 0x23e   : > { %v833_v59 = vmul.f32 %v1789_v53, %v809_v55  ;;  %v745_v60 = vadd.f32 %v1219_v58, %v1778_v50  ;;  %v739_v61 = vpop.f32.mrb[3].mxu1 }
 0x23f   : > { %v832_v62 = vmul.f32 %v1789_v53, %v808_v57  ;;  %v740_v63 = vadd.f32 %v1778_v50, %v739_v61 }
 0x240   : > { %v1799_v0 = vadd.f32 %v1792_v56, %v833_v59  ;;  %v811_v1 = vmax.f32 %v745_v60, 0.0 }
 0x241   : > { %v1802_v2 = vadd.f32 %v1792_v56, %v832_v62  ;;  %v810_v3 = vmax.f32 %v740_v63, 0.0  ;;  %v1222_v4 = vpop.f32.mrb[4].mxu1 }
 0x242   : > { %v873_v5 = vmax.f32 %v1799_v0, 0.0  ;;  %v835_v6 = vmul.f32 %v1789_v53, %v811_v1  ;;  %v755_v7 = vadd.f32 %v1222_v4, %v1778_v50  ;;  %v749_v8 = vpop.f32.mrb[5].mxu1 }
 0x243   : > { %v872_v9 = vmax.f32 %v1802_v2, 0.0  ;;  %v834_v10 = vmul.f32 %v1789_v53, %v810_v3  ;;  %v750_v12 = vadd.f32 %v1778_v50, %v749_v8 }
 0x244   : > { %v1811_v11 = vadd.f32 %v1792_v56, %v835_v6  ;;  %v813_v13 = vmax.f32 %v755_v7, 0.0  ;;  %893 = vst [vmem:[#allocation9 + $0x8] sm:$0xff] (!%p1090_p5), %v873_v5 }
 0x245   : > { %v1814_v14 = vadd.f32 %v1792_v56, %v834_v10  ;;  %v812_v15 = vmax.f32 %v750_v12, 0.0  ;;  %v1225_v17 = vpop.f32.mrb[6].mxu1  ;;  %892 = vst [vmem:[#allocation9] sm:$0xff] (!%p1090_p5), %v872_v9 }
 0x246   : > { %v875_v18 = vmax.f32 %v1811_v11, 0.0  ;;  %v837_v16 = vmul.f32 %v1789_v53, %v813_v13  ;;  %v765_v19 = vadd.f32 %v1225_v17, %v1778_v50  ;;  %v759_v20 = vpop.f32.mrb[7].mxu1 }
 0x247   : > { %v874_v22 = vmax.f32 %v1814_v14, 0.0  ;;  %v836_v23 = vmul.f32 %v1789_v53, %v812_v15  ;;  %v760_v24 = vadd.f32 %v1778_v50, %v759_v20 }
 0x248   : > { %v1823_v26 = vadd.f32 %v1792_v56, %v837_v16  ;;  %v815_v27 = vmax.f32 %v765_v19, 0.0  ;;  %895 = vst [vmem:[#allocation9 + $0x18] sm:$0xff] (!%p1090_p5), %v875_v18 }
 0x249   : > { %v1826_v28 = vadd.f32 %v1792_v56, %v836_v23  ;;  %v814_v30 = vmax.f32 %v760_v24, 0.0  ;;  %v1228_v21 = vpop.f32.mrb[8].mxu1  ;;  %894 = vst [vmem:[#allocation9 + $0x10] sm:$0xff] (!%p1090_p5), %v874_v22 }
 0x24a   : > { %v877_v31 = vmax.f32 %v1823_v26, 0.0  ;;  %v839_v32 = vmul.f32 %v1789_v53, %v815_v27  ;;  %v775_v34 = vadd.f32 %v1228_v21, %v1778_v50  ;;  %v769_v35 = vpop.f32.mrb[9].mxu1 }
 0x24b   : > { %v876_v36 = vmax.f32 %v1826_v28, 0.0  ;;  %v838_v25 = vmul.f32 %v1789_v53, %v814_v30  ;;  %v770_v37 = vadd.f32 %v1778_v50, %v769_v35 }
 0x24c   : > { %v1835_v38 = vadd.f32 %v1792_v56, %v839_v32  ;;  %v817_v39 = vmax.f32 %v775_v34, 0.0  ;;  %897 = vst [vmem:[#allocation9 + $0x28] sm:$0xff] (!%p1090_p5), %v877_v31 }
 0x24d   : > { %v1838_v40 = vadd.f32 %v1792_v56, %v838_v25  ;;  %v816_v41 = vmax.f32 %v770_v37, 0.0  ;;  %v1231_v42 = vpop.f32.mrb[10].mxu1  ;;  %896 = vst [vmem:[#allocation9 + $0x20] sm:$0xff] (!%p1090_p5), %v876_v36 }
 0x24e   : > { %v879_v43 = vmax.f32 %v1835_v38, 0.0  ;;  %v841_v44 = vmul.f32 %v1789_v53, %v817_v39  ;;  %v785_v29 = vadd.f32 %v1231_v42, %v1778_v50  ;;  %v779_v45 = vpop.f32.mrb[11].mxu1 }
 0x24f   : > { %v878_v46 = vmax.f32 %v1838_v40, 0.0  ;;  %v840_v47 = vmul.f32 %v1789_v53, %v816_v41  ;;  %v780_v48 = vadd.f32 %v1778_v50, %v779_v45 }
 0x250   : > { %v1847_v33 = vadd.f32 %v1792_v56, %v841_v44  ;;  %v819_v51 = vmax.f32 %v785_v29, 0.0  ;;  %899 = vst [vmem:[#allocation9 + $0x38] sm:$0xff] (!%p1090_p5), %v879_v43 }
 0x251   : > { %v864_v49 = vadd.f32 %v1792_v56, %v840_v47  ;;  %v818_v52 = vmax.f32 %v780_v48, 0.0  ;;  %v1234_v54 = vpop.f32.mrb[12].mxu1  ;;  %898 = vst [vmem:[#allocation9 + $0x30] sm:$0xff] (!%p1090_p5), %v878_v46 }
 0x252   : > { %v881_v55 = vmax.f32 %v1847_v33, 0.0  ;;  %v843_v57 = vmul.f32 %v1789_v53, %v819_v51  ;;  %v795_v58 = vadd.f32 %v1234_v54, %v1778_v50  ;;  %v789_v59 = vpop.f32.mrb[13].mxu1 }
 0x253   : > { %v880_v60 = vmax.f32 %v864_v49, 0.0  ;;  %v842_v61 = vmul.f32 %v1789_v53, %v818_v52  ;;  %v790_v62 = vadd.f32 %v1778_v50, %v789_v59 }
 0x254   : > { %v867_v63 = vadd.f32 %v1792_v56, %v843_v57  ;;  %v821_v1 = vmax.f32 %v795_v58, 0.0  ;;  %901 = vst [vmem:[#allocation9 + $0x48] sm:$0xff] (!%p1090_p5), %v881_v55 }
 0x255   : > { %v866_v3 = vadd.f32 %v1792_v56, %v842_v61  ;;  %v820_v4 = vmax.f32 %v790_v62, 0.0  ;;  %v1237_v6 = vpop.f32.mrb[14].mxu1  ;;  %900 = vst [vmem:[#allocation9 + $0x40] sm:$0xff] (!%p1090_p5), %v880_v60 }
 0x256   : > { %v883_v7 = vmax.f32 %v867_v63, 0.0  ;;  %v845_v8 = vmul.f32 %v1789_v53, %v821_v1  ;;  %v805_v10 = vadd.f32 %v1237_v6, %v1778_v50  ;;  %v799_v12 = vpop.f32.mrb[15].mxu1 }
 0x257   : > { %v882_v13 = vmax.f32 %v866_v3, 0.0  ;;  %v844_v15 = vmul.f32 %v1789_v53, %v820_v4  ;;  %v800_v17 = vadd.f32 %v1778_v50, %v799_v12 }
 0x258   : > { %v869_v16 = vadd.f32 %v1792_v56, %v845_v8  ;;  %v823_v19 = vmax.f32 %v805_v10, 0.0  ;;  %903 = vst [vmem:[#allocation9 + $0x58] sm:$0xff] (!%p1090_p5), %v883_v7 }
 0x259   : > { %v868_v20 = vadd.f32 %v1792_v56, %v844_v15  ;;  %v822_v23 = vmax.f32 %v800_v17, 0.0  ;;  %891 = sbr.rel (%p1090_p5) target bundleno = 610 (0x262), region = 68  ;;  %902 = vst [vmem:[#allocation9 + $0x50] sm:$0xff] (!%p1090_p5), %v882_v13 }
 0x25a   : > { %v885_v24 = vmax.f32 %v869_v16, 0.0  ;;  %v847_v27 = vmul.f32 %v1789_v53, %v823_v19 }
 0x25b   : > { %v884_v30 = vmax.f32 %v868_v20, 0.0  ;;  %v846_v21 = vmul.f32 %v1789_v53, %v822_v23 }
 0x25c   : > { %v871_v32 = vadd.f32 %v1792_v56, %v847_v27  ;;  %905 = vst [vmem:[#allocation9 + $0x68] sm:$0xff] (!%p1090_p5), %v885_v24 }
 0x25d   : > { %v870_v34 = vadd.f32 %v1792_v56, %v846_v21  ;;  %904 = vst [vmem:[#allocation9 + $0x60] sm:$0xff] (!%p1090_p5), %v884_v30 }
 0x25e   : > { %v887_v35 = vmax.f32 %v871_v32, 0.0 }
 0x25f   : > { %v886_v25 = vmax.f32 %v870_v34, 0.0 }
 0x260   : > { %907 = vst [vmem:[#allocation9 + $0x78] sm:$0xff] %v887_v35 }
 0x261   : > { %906 = vst [vmem:[#allocation9 + $0x70] sm:$0xff] %v886_v25 }
 0x262 PF: > { %p1091_p6 = scmp.ge.s32.totalorder %s1495_s24, 1 }
 0x263   : > { %v912_v50 = vpack.c.bf16 (!%p1091_p6), %v873_v5, %v872_v9  ;;  %s1101_s8 = sshll.u32 (!%p1091_p6), %s409_s29, 6  ;;  %v913_v53 = vpack.c.bf16 (!%p1091_p6), %v875_v18, %v874_v22  ;;  %v914_v56 = vpack.c.bf16 (!%p1091_p6), %v877_v31, %v876_v36  ;;  %v915_v2 = vpack.c.bf16 (!%p1091_p6), %v879_v43, %v878_v46 }
 0x264   : > { %911 = sbr.rel (%p1091_p6) target bundleno = 619 (0x26b), region = 72  ;;  %v916_v0 = vpack.c.bf16 (!%p1091_p6), %v881_v55, %v880_v60  ;;  %v917_v37 = vpack.c.bf16 (!%p1091_p6), %v883_v7, %v882_v13  ;;  %v918_v5 = vpack.c.bf16 (!%p1091_p6), %v885_v24, %v884_v30  ;;  %v919_v9 = vpack.c.bf16 (!%p1091_p6), %v887_v35, %v886_v25  ;;  %s923_s24 = scalar_lea.vmem (!%p1091_p6), [#allocation2], %s1101_s8 }
 0x265   : > { %924 = vst [vmem:[%s923_s24] sm:$0xff] (!%p1091_p6), %v912_v50  ;;  %925 = vst [vmem:[%s923_s24 + $0x8] sm:$0xff] (!%p1091_p6), %v913_v53 }
 0x266   : > { %926 = vst [vmem:[%s923_s24 + $0x10] sm:$0xff] (!%p1091_p6), %v914_v56  ;;  %927 = vst [vmem:[%s923_s24 + $0x18] sm:$0xff] (!%p1091_p6), %v915_v2 }
 0x267   : > { %928 = vst [vmem:[%s923_s24 + $0x20] sm:$0xff] (!%p1091_p6), %v916_v0  ;;  %929 = vst [vmem:[%s923_s24 + $0x28] sm:$0xff] (!%p1091_p6), %v917_v37 }
 0x268   : > { %930 = vst [vmem:[%s923_s24 + $0x30] sm:$0xff] (!%p1091_p6), %v918_v5  ;;  %931 = vst [vmem:[%s923_s24 + $0x38] sm:$0xff] (!%p1091_p6), %v919_v9 }
 0x26b PF: > { %s1959_s29 = sadd.s32 4294967295, %s1503_s26   ;;  %s1512_s10 = smov [#allocation9]  }
 0x26c   : > { %p1905_p9 = scmp.eq.s32.totalorder %s1959_s29, 1  ;;  %s948_s18 = sshll.u32 %s1512_s10, 4  ;;  %s949_s18 = int_to_ptr.vmem [resolvable:$true] %s948_s18 }
 0x26d   : > { %s1443_s17 = scalar_lea.vmem %s949_s18, 2048  ;;  %s1449_s27 = scalar_lea.vmem %s949_s18, 4096 }
 0x26e   : > { %p1444_p10 = scmp.ne.s32.totalorder %s949_s18, %s1443_s17  ;;  %p1450_p13 = scmp.lt.s32.totalorder %s949_s18, %s949_s18 }
 0x26f   : > { %p1451_p0 = scmp.lt.s32.totalorder %s1449_s27, %s1443_s17 }
 0x270   : > { %p1445_p11 = pnand %p1444_p10, %p1905_p9 }
 0x271   : > { %p1452_p1 = por %p1451_p0, %p1450_p13 }
 0x272   : > { %p1446_p12 = pneg %p1445_p11 }
 0x274   : > { %p1453_p4 = pnand %p1452_p1, %p1446_p12 }
 0x276   : > { %1456 = shalt.err (!%p1453_p4)
}
 0x277   : > { %s1457_s14 = scalar_lea.hbm %s1946_s7, 2048 }
 0x278   : > { %p1458_p7 = scmp.ne.s32.totalorder %s1946_s7, %s1457_s14  ;;  %p1463_p8 = scmp.lt.u32.totalorder %s1457_s14, %s1946_s7 }
 0x27a   : > { %p1459_p2 = pnand %p1458_p7, %p1905_p9 }
 0x27c   : > { %p1460_p3 = pneg %p1459_p2 }
 0x27e   : > { %p1465_p5 = pnand %p1463_p8, %p1460_p3 }
 0x280   : > { %1468 = shalt.err (!%p1465_p5)
}
 0x281   : > { %s1513_s9 = smov 128   ;;  %s1514_s12 = smov 8  }
 0x282   : > { %1283 = dma.vmem_to_hbm [thread:$0]  (%p1905_p9), %s949_s18, 2048, %s1946_s7, [#allocation5], %s1513_s9, %s1513_s9, %s1514_s12  }
 0x283 PF: > { %p1307_p6 = scmp.ge.s32.totalorder %s1503_s26, 2  ;;  %s1961_s15 = sadd.s32 4294967294, %s1503_s26  }
 0x284   : > { %p1308_p10 = scmp.eq.s32.totalorder %s1961_s15, 1 }
 0x286   : > { %p1297_p11 = pnand %p1308_p10, %p1307_p6 }
 0x288   : > { %1490 = dma.done.wait (!%p1297_p11), [#allocation5], 2048  }
 0x289   : > { %1492 = vsyncadd (!%p1297_p11), [#allocation5], 4294965248  ;;  %s22_s26 = sadd.s32 1, %s1503_s26   ;;  %s1962_s24 = smov %s1499_s25 }
 0x28a   : > { %p19_p12 = scmp.ge.s32.totalorder %s22_s26, 4   ;;  %s1963_s25 = smov %s1965_s11 }
 0x28c   :  { %21 = sbr.rel (!%p19_p12) target bundleno = 5 (0x5), region = 115 }
 0x293   :  { %969 = vsyncpa [#allocation4], 1 }
 0x294   :  { %971 = vsyncpa [#allocation4 + $0x1], 1 }
 0x295   :  { %972 = vsyncpa [#allocation7], 1 }
 0x296   :  { %973 = vsyncpa [#allocation5], 1 }
 0x297   :  { %975 = vsyncpa [#allocation5 + $0x1], 1 }

</bundles_post_ra>
